<compile_context>
chip_gen: v7x
topology: tpu7x:2x2x1
jax: 0.10.0
libtpu: 0.0.40
codegen_flags: <defaults>
</compile_context>

<pallas_src>
import functools

import jax
import jax.numpy as jnp
from jax.experimental import pallas as pl
from jax.experimental.pallas import tpu as pltpu


def policy_kernel(x_ref, w1_ref, w2_ref, out_ref, *, valid_rows):
    # ---- fused MLP: h = relu(x_aug @ W1_aug); logits = h @ W2_aug ----
    # Bias terms ride along via the folded weights (ones column in x_aug,
    # constant-1 lane in h), so there are no separate bias adds / DMAs.
    x = x_ref[...]                                                       # (Bp, in_p)
    h = jnp.dot(x, w1_ref[...], preferred_element_type=jnp.float32)     # (Bp, hid_p)
    h = jnp.maximum(h, 0.0)                                              # ReLU (relu(1)=1 keeps bias lane)
    logits = jnp.dot(h, w2_ref[...], preferred_element_type=jnp.float32)  # (Bp, out)

    # ---- softmax over the *flattened* valid logits (matches torch .flatten()) ----
    row = jax.lax.broadcasted_iota(jnp.int32, logits.shape, 0)
    valid = row < valid_rows                              # mask padded batch rows
    masked = jnp.where(valid, logits, jnp.float32(-1e30))

    m = jnp.max(masked, keepdims=True)                    # (1, 1) global max
    e = jnp.where(valid, jnp.exp(masked - m), 0.0)
    s = jnp.sum(e, keepdims=True)                         # (1, 1) global sum

    inv = pl.reciprocal(s, approx=True)                   # EUP vrcp
    inv = inv * (2.0 - s * inv)                           # one Newton step -> full f32 accuracy
    out_ref[...] = e * inv


def fold_params(w1, b1, w2, b2, *, in_pad=8, hid_pad=128):
    """Fold biases into the weights and pad to vreg-native shapes.  Done once."""
    in_size, hid = w1.shape
    out_size = w2.shape[1]
    assert in_size + 1 <= in_pad and hid + 1 <= hid_pad

    # W1_aug: rows 0..in-1 = W1, row `in` = b1, plus a 1.0 that forwards the
    # ones column of x into hidden lane `hid` (so layer 2 can pick up b2).
    w1_aug = jnp.zeros((in_pad, hid_pad), jnp.float32)
    w1_aug = w1_aug.at[:in_size, :hid].set(w1.astype(jnp.float32))
    w1_aug = w1_aug.at[in_size, :hid].set(b1.reshape(-1).astype(jnp.float32))
    w1_aug = w1_aug.at[in_size, hid].set(1.0)

    # W2_aug: rows 0..hid-1 = W2, row `hid` = b2, padded rows = 0.
    w2_aug = jnp.zeros((hid_pad, out_size), jnp.float32)
    w2_aug = w2_aug.at[:hid, :].set(w2.astype(jnp.float32))
    w2_aug = w2_aug.at[hid, :].set(b2.reshape(-1).astype(jnp.float32))

    return w1_aug, w2_aug


@functools.partial(jax.jit, static_argnames=("in_size",))
def policy_forward(x, w1_aug, w2_aug, *, in_size):
    """x: (B, in_size) float32. Returns softmax over flattened logits, shape (B*out,)."""
    B = x.shape[0]
    in_pad = w1_aug.shape[0]
    out_size = w2_aug.shape[1]
    B_pad = ((B + 7) // 8) * 8                       # f32 sublane multiple

    # Augmented / padded activations: real features, a ones column for the
    # bias row of W1_aug, zeros elsewhere (padded rows masked in-kernel).
    x_aug = jnp.zeros((B_pad, in_pad), jnp.float32)
    x_aug = x_aug.at[:B, :in_size].set(x.astype(jnp.float32))
    x_aug = x_aug.at[:, in_size].set(1.0)

    kernel = functools.partial(policy_kernel, valid_rows=B)
    probs2d = pl.pallas_call(
        kernel,
        out_shape=jax.ShapeDtypeStruct((B_pad, out_size), jnp.float32),
        in_specs=[
            pl.BlockSpec(memory_space=pltpu.VMEM),   # x_aug   (B_pad, in_pad)
            pl.BlockSpec(memory_space=pltpu.VMEM),   # W1_aug  (in_pad, 128)
            pl.BlockSpec(memory_space=pltpu.VMEM),   # W2_aug  (128, out)
        ],
        out_specs=pl.BlockSpec(memory_space=pltpu.VMEM),
    )(x_aug, w1_aug, w2_aug)

    # `.flatten()` in the torch module: final shape is 1D of length B*out.
    return probs2d[:B].reshape(-1)


def init_params(key, input_size, hidden_size, output_size):
    """Deterministic PyTorch-style uniform(-1/sqrt(fan_in), 1/sqrt(fan_in)) init."""
    k1, k2, k3, k4 = jax.random.split(key, 4)
    bound1 = 1.0 / jnp.sqrt(jnp.float32(input_size))
    bound2 = 1.0 / jnp.sqrt(jnp.float32(hidden_size))
    w1 = jax.random.uniform(k1, (input_size, hidden_size), jnp.float32, -bound1, bound1)
    b1 = jax.random.uniform(k2, (hidden_size,), jnp.float32, -bound1, bound1)
    w2 = jax.random.uniform(k3, (hidden_size, output_size), jnp.float32, -bound2, bound2)
    b2 = jax.random.uniform(k4, (output_size,), jnp.float32, -bound2, bound2)
    return w1, b1, w2, b2


def _reference(x, w1, b1, w2, b2):
    h = jnp.maximum(x @ w1 + b1[None, :], 0.0)
    logits = (h @ w2 + b2[None, :]).reshape(-1)
    return jax.nn.softmax(logits, axis=-1)


if __name__ == "__main__":
    input_size = 4      # CartPole-v1 observation dim
    hidden_size = 64
    output_size = 2     # CartPole-v1 action space

    key = jax.random.PRNGKey(0)
    kx1, kx2, kp = jax.random.split(key, 3)
    w1, b1, w2, b2 = init_params(kp, input_size, hidden_size, output_size)
    w1_aug, w2_aug = fold_params(w1, b1, w2, b2)

    # Small batch (matches the original usage; exercises padding 2 -> 8 rows).
    x_small = jax.random.normal(kx1, (2, input_size), jnp.float32)
    probs_small = jax.block_until_ready(
        policy_forward(x_small, w1_aug, w2_aug, in_size=input_size))
    ref_small = _reference(x_small, w1, b1, w2, b2)
    assert probs_small.shape == (2 * output_size,)
    assert jnp.allclose(probs_small, ref_small, atol=1e-5, rtol=1e-5)
    assert jnp.allclose(jnp.sum(probs_small), 1.0, atol=1e-5)

    # Non-multiple-of-8 batch (exercises the in-kernel padded-row masking).
    x_odd = jax.random.normal(kx2, (5, input_size), jnp.float32)
    probs_odd = jax.block_until_ready(
        policy_forward(x_odd, w1_aug, w2_aug, in_size=input_size))
    ref_odd = _reference(x_odd, w1, b1, w2, b2)
    assert probs_odd.shape == (5 * output_size,)
    assert jnp.allclose(probs_odd, ref_odd, atol=1e-5, rtol=1e-5)
    assert jnp.allclose(jnp.sum(probs_odd), 1.0, atol=1e-5)

    print("KERNEL_OK")
</pallas_src>

<mosaic_0001>
module attributes {stable_mosaic.version = 11 : i64} {
  func.func @policy_kernel(%arg0: memref<8x8xf32, #tpu.memory_space<vmem>>, %arg1: memref<8x128xf32, #tpu.memory_space<vmem>>, %arg2: memref<128x2xf32, #tpu.memory_space<vmem>>, %arg3: memref<8x2xf32, #tpu.memory_space<vmem>>) attributes {dimension_semantics = [], scalar_prefetch = 0 : i64, scratch_operands = 0 : i64, tpu.core_type = #tpu.core_type<tc>} {
    %c0 = arith.constant 0 : index
    %c0_0 = arith.constant 0 : index
    %0 = vector.load %arg0[%c0, %c0_0] : memref<8x8xf32, #tpu.memory_space<vmem>>, vector<8x8xf32>
    %c0_1 = arith.constant 0 : index
    %c0_2 = arith.constant 0 : index
    %1 = vector.load %arg1[%c0_1, %c0_2] : memref<8x128xf32, #tpu.memory_space<vmem>>, vector<8x128xf32>
    %cst = arith.constant dense<0.000000e+00> : vector<8x128xf32>
    %2 = tpu.matmul %0, %1, %cst {dimension_numbers = #tpu.dot_dimension_numbers<[1], [0], [0], [1], [0, 0, 1, 1], [], []>} : vector<8x8xf32>, vector<8x128xf32>, vector<8x128xf32> -> vector<8x128xf32>
    %cst_3 = arith.constant 0.000000e+00 : f32
    %3 = vector.broadcast %cst_3 : f32 to vector<8x128xf32>
    %4 = arith.maximumf %2, %3 : vector<8x128xf32>
    %c0_4 = arith.constant 0 : index
    %c0_5 = arith.constant 0 : index
    %5 = vector.load %arg2[%c0_4, %c0_5] : memref<128x2xf32, #tpu.memory_space<vmem>>, vector<128x2xf32>
    %cst_6 = arith.constant dense<0.000000e+00> : vector<8x2xf32>
    %6 = tpu.matmul %4, %5, %cst_6 {dimension_numbers = #tpu.dot_dimension_numbers<[1], [0], [0], [1], [0, 0, 1, 1], [], []>} : vector<8x128xf32>, vector<128x2xf32>, vector<8x2xf32> -> vector<8x2xf32>
    %7 = tpu.iota {dimensions = array<i32: 0>} : vector<8x2xi32>
    %c2_i32 = arith.constant 2 : i32
    %8 = vector.broadcast %c2_i32 : i32 to vector<8x2xi32>
    %9 = arith.cmpi slt, %7, %8 : vector<8x2xi32>
    %cst_7 = arith.constant -1.000000e+30 : f32
    %10 = vector.broadcast %cst_7 : f32 to vector<8x2xf32>
    %11 = arith.select %9, %6, %10 : vector<8x2xi1>, vector<8x2xf32>
    %12 = vector.shape_cast %11 : vector<8x2xf32> to vector<1x8x2xf32>
    %cst_8 = arith.constant dense<0xFF800000> : vector<1xf32>
    %13 = vector.multi_reduction <maximumf>, %12, %cst_8 [1, 2] : vector<1x8x2xf32> to vector<1xf32>
    %14 = vector.shape_cast %13 : vector<1xf32> to vector<1x1x1xf32>
    %15 = vector.extract %14[0, 0, 0] : f32 from vector<1x1x1xf32>
    %16 = vector.broadcast %15 : f32 to vector<1x1xf32>
    %17 = vector.broadcast %16 : vector<1x1xf32> to vector<8x2xf32>
    %18 = arith.subf %11, %17 : vector<8x2xf32>
    %19 = math.exp %18 : vector<8x2xf32>
    %cst_9 = arith.constant 0.000000e+00 : f32
    %20 = vector.broadcast %cst_9 : f32 to vector<8x2xf32>
    %21 = arith.select %9, %19, %20 : vector<8x2xi1>, vector<8x2xf32>
    %22 = vector.shape_cast %21 : vector<8x2xf32> to vector<1x8x2xf32>
    %cst_10 = arith.constant dense<0.000000e+00> : vector<1xf32>
    %23 = vector.multi_reduction <add>, %22, %cst_10 [1, 2] : vector<1x8x2xf32> to vector<1xf32>
    %24 = vector.shape_cast %23 : vector<1xf32> to vector<1x1x1xf32>
    %25 = vector.extract %24[0, 0, 0] : f32 from vector<1x1x1xf32>
    %26 = vector.broadcast %25 : f32 to vector<1x1xf32>
    %27 = tpu.reciprocal %26 {approx = true} : vector<1x1xf32> -> vector<1x1xf32>
    %28 = arith.mulf %26, %27 : vector<1x1xf32>
    %cst_11 = arith.constant 2.000000e+00 : f32
    %29 = vector.broadcast %cst_11 : f32 to vector<1x1xf32>
    %30 = arith.subf %29, %28 : vector<1x1xf32>
    %31 = arith.mulf %27, %30 : vector<1x1xf32>
    %32 = vector.broadcast %31 : vector<1x1xf32> to vector<8x2xf32>
    %33 = arith.mulf %21, %32 : vector<8x2xf32>
    %c0_12 = arith.constant 0 : index
    %c0_13 = arith.constant 0 : index
    %34 = vector.load %arg3[%c0_12, %c0_13] : memref<8x2xf32, #tpu.memory_space<vmem>>, vector<8x2xf32>
    tpu.vector_store %arg3[%c0_12, %c0_13], %33 {strides = array<i32>} : memref<8x2xf32, #tpu.memory_space<vmem>>, vector<8x2xf32>,
    return
  }
}

</mosaic_0001>

<bundles_post_ra>
// kernel: policy_forward.1
= control target key start
LH: loop header
LB: loop body
LE: loop exit
PB: predicated region body
PF: predicated region fallthrough
CT: control target
= control target key end

     0   :  { %vm16_vm0 = vcmask 64512   ;;  %v313_v0 = vmov 0.0   ;;  %vm314_vm1 = vmmov 0   ;;  %v315_v4 = vmov 0.0|0.0   ;;  %s398_s1 = inlined_call_operand.vmem [shape: f32[8,128], index: 1, kind: input, shape index: {}]   ;;  %s399_s0 = inlined_call_operand.vmem [shape: f32[8,8], index: 0, kind: input, shape index: {}]   ;;  %s400_s2 = inlined_call_operand.vmem [shape: f32[128,2], index: 2, kind: input, shape index: {}]   ;;  %s401_s3 = inlined_call_operand.vmem [shape: f32[8,2], index: 3, kind: output, shape index: {}]  }
   0x1   :  { %238 = vmatprep.subr.mxu0 %v313_v0  ;;  %v15_v1 = vld [vmem:[%s398_s1] sm:$0xff]  ;;  %240 = vmatprep.mubr.msk.f32.mxu0 %vm314_vm1, %v313_v0  ;;  %v92_v5 = vld [vmem:[%s400_s2 + $0x8] sm:$0xff]  ;;  %v93_v6 = vld [vmem:[%s400_s2 + $0x10] sm:$0xff]  ;;  %v177_v31 = vlaneseq  ;;  %vm181_vm3 = vcmask 15360  }
   0x2   :  { %v14_v2 = vld [vmem:[%s399_s0] sm:$0xff]  ;;  %239 = vmatpush3.msra.mxu0 %v15_v1  ;;  %278 = vmatprep.subr.bf16.mxu1 %v315_v4  ;;  %v94_v7 = vld [vmem:[%s400_s2 + $0x18] sm:$0xff]  ;;  %v96_v11 = vld [vmem:[%s400_s2 + $0x28] sm:$0xff] }
   0x3   :  { %v91_v3 = vld [vmem:[%s400_s2] sm:$0xff]  ;;  %241 = vmatmul.mubr.msk.f32.vlgmr.msra.gmra.mrb[0].mxu0 %vm16_vm0, %v14_v2  ;;  %275 = vmatprep.mubr.msk.f32.mxu1 %vm314_vm1, %v313_v0  ;;  %v282_v9 = vpack.c.bf16 %v94_v7, %v93_v6  ;;  %v97_v13 = vld [vmem:[%s400_s2 + $0x30] sm:$0xff]  ;;  %v98_v14 = vld [vmem:[%s400_s2 + $0x38] sm:$0xff]  ;;  %v178_v32 = vshrl.u32 %v177_v31, 7 }
   0x4   :  { %v279_v8 = vpack.c.bf16 %v92_v5, %v91_v3  ;;  %v95_v10 = vld [vmem:[%s400_s2 + $0x20] sm:$0xff]  ;;  %v288_v15 = vpack.c.bf16 %v98_v14, %v97_v13  ;;  %v100_v17 = vld [vmem:[%s400_s2 + $0x48] sm:$0xff]  ;;  %v101_v19 = vld [vmem:[%s400_s2 + $0x50] sm:$0xff] }
   0x5   :  { %v285_v12 = vpack.c.bf16 %v96_v11, %v95_v10  ;;  %v99_v16 = vld [vmem:[%s400_s2 + $0x40] sm:$0xff]  ;;  %v102_v20 = vld [vmem:[%s400_s2 + $0x58] sm:$0xff]  ;;  %v104_v23 = vld [vmem:[%s400_s2 + $0x68] sm:$0xff]  ;;  %vm179_vm2 = vcmp.lt.s32.totalorder %v178_v32, 2 }
   0x6   :  { %280 = vmatpush3.bf16.msra.mxu1 %v279_v8  ;;  %v291_v18 = vpack.c.bf16 %v100_v17, %v99_v16  ;;  %v294_v21 = vpack.c.bf16 %v102_v20, %v101_v19  ;;  %v103_v22 = vld [vmem:[%s400_s2 + $0x60] sm:$0xff]  ;;  %v105_v25 = vld [vmem:[%s400_s2 + $0x70] sm:$0xff]  ;;  %v106_v26 = vld [vmem:[%s400_s2 + $0x78] sm:$0xff] }
   0x7   :  { %281 = vmatprep.subr.bf16.mxu1 %v315_v4  ;;  %v297_v24 = vpack.c.bf16 %v104_v23, %v103_v22  ;;  %v300_v27 = vpack.c.bf16 %v106_v26, %v105_v25 }
   0xa   :  { %283 = vmatpush3.bf16.msra.mxu1 %v282_v9 }
   0xb   :  { %284 = vmatprep.subr.bf16.mxu1 %v315_v4 }
   0xe   :  { %286 = vmatpush3.bf16.msra.mxu1 %v285_v12 }
   0xf   :  { %287 = vmatprep.subr.bf16.mxu1 %v315_v4 }
  0x12   :  { %289 = vmatpush3.bf16.msra.mxu1 %v288_v15 }
  0x13   :  { %290 = vmatprep.subr.bf16.mxu1 %v315_v4 }
  0x16   :  { %292 = vmatpush3.bf16.msra.mxu1 %v291_v18 }
  0x17   :  { %293 = vmatprep.subr.bf16.mxu1 %v315_v4 }
  0x1a   :  { %295 = vmatpush3.bf16.msra.mxu1 %v294_v21 }
  0x1b   :  { %296 = vmatprep.subr.bf16.mxu1 %v315_v4 }
  0x1e   :  { %298 = vmatpush3.bf16.msra.mxu1 %v297_v24 }
  0x1f   :  { %299 = vmatprep.subr.bf16.mxu1 %v315_v4 }
  0x22   :  { %301 = vmatpush3.bf16.msra.mxu1 %v300_v27 }
  0xd6   :  { %v86_v28 = vpop.f32.mrb[0].mxu0 }
  0xd7   :  { %v90_v29 = vmax.f32 %v86_v28, 0.0  ;;  %v242_v30 = vpop.f32.mrb[1].mxu0 }
  0xd9   :  { %276 = vmatmul.mubr.f32.vlgmr.msra.gmra.mrb[0].mxu1 %v90_v29 }
 0x1ac   :  { %v173_v33 = vpop.f32.mrb[0].mxu1 }
 0x1ad   :  { %v180_v34 = vsel %vm179_vm2, %v173_v33, -1e+30  ;;  %v277_v35 = vpop.f32.mrb[1].mxu1 }
 0x1ae   :  { %v182_v36 = vsel %vm181_vm3, %v180_v34, -inf }
 0x1af   :  { %183 = vmax.xlane.f32.xlu0 %v182_v36 }
 0x23c   :  { %v184_v37 = vpop.xlane.xlu0 %183 }
 0x23d   :  { %v185_v38 = vrot.slane %v184_v37, 4 }
 0x23f   :  { %v186_v39 = vmax.f32 %v184_v37, %v185_v38 }
 0x241   :  { %v187_v40 = vrot.slane %v186_v39, 2 }
 0x243   :  { %v188_v41 = vmax.f32 %v186_v39, %v187_v40 }
 0x245   :  { %v189_v42 = vrot.slane %v188_v41, 1 }
 0x247   :  { %v190_v43 = vmax.f32 %v188_v41, %v189_v42 }
 0x249   :  { %302 = vpush %v190_v43 }
 0x27a   :  { %s303_s2 = spop %302 }
 0x27b   :  { %v192_v44 = vstv %s303_s2 }
 0x27c   :  { %v193_v45 = vsub.f32 %v180_v34, %v192_v44 }
 0x27e   :  { %v194_v46 = vmul.f32 1.442695, %v193_v45 }
 0x280   :  { %309 = vpow2.f32 %v194_v46 }
 0x28a   :  { %v310_v47 = vpop.eup %309 }
 0x28b   :  { %v196_v48 = vsel %vm179_vm2, %v310_v47, 0.0 }
 0x28c   :  { %v197_v49 = vsel %vm181_vm3, %v196_v48, 0.0 }
 0x28d   :  { %198 = vadd.xlane.f32.xlu0 %v197_v49 }
 0x31a   :  { %v199_v50 = vpop.xlane.xlu0 %198 }
 0x31b   :  { %v200_v51 = vrot.slane %v199_v50, 4 }
 0x31d   :  { %v201_v52 = vadd.f32 %v200_v51, %v199_v50 }
 0x31f   :  { %v202_v53 = vrot.slane %v201_v52, 2 }
 0x321   :  { %v203_v54 = vadd.f32 %v202_v53, %v201_v52 }
 0x323   :  { %v204_v55 = vrot.slane %v203_v54, 1 }
 0x325   :  { %v205_v56 = vadd.f32 %v204_v55, %v203_v54 }
 0x327   :  { %304 = vpush %v205_v56 }
 0x358   :  { %s305_s19 = spop %304 }
 0x359   :  { %v207_v57 = vstv %s305_s19 }
 0x35a   :  { %311 = vrcp.f32 %v207_v57 }
 0x364   :  { %v312_v58 = vpop.eup %311 }
 0x365   :  { %v209_v59 = vmul.f32 %v312_v58, %v207_v57 }
 0x367   :  { %v210_v60 = vsub.f32 2.0, %v209_v59 }
 0x369   :  { %v211_v61 = vmul.f32 %v312_v58, %v210_v60 }
 0x36b   :  { %v212_v62 = vmul.f32 %v211_v61, %v196_v48 }
 0x36d   :  { %213 = vst.msk [vmem:[%s401_s3] sm:$0xff] %vm181_vm3, %v212_v62 }

</bundles_post_ra>
